<compile_context>
chip_gen: v7x
topology: tpu7x:2x2x1
jax: 0.10.0
libtpu: 0.0.40
codegen_flags: <defaults>
</compile_context>

<pallas_src>
import math

import numpy as np
import jax
import jax.numpy as jnp
from jax.experimental import pallas as pl
from jax.experimental.pallas import tpu as pltpu


def mdct_syn_init(filtlen, N):
    """Deterministic MDCT synthesis filterbank, same math as the PyTorch init."""
    w = np.zeros((N, 1, filtlen, 1), dtype=np.float32)
    n = np.arange(filtlen)
    for k in range(N):
        w[k, 0, :, 0] = (
            np.sin(np.pi / filtlen * (n + 0.5))
            * np.sqrt(2.0 / N)
            * np.cos(np.pi / N * (k + 0.5) * (n + 0.5 - N / 2))
        )
    return w


def _round_up(a, b):
    return ((a + b - 1) // b) * b


def _cdiv(a, b):
    return -(-a // b)


def _build_group_matrices(w2, N, filtlen, G, P):
    """Fold frame synthesis + overlap-add into P dense (G*N, G*N) matrices.

    M_p maps input group s-p (G frames x N subbands, frame-major / channel-minor
    along lanes) to output group s (G frames x N samples, frame-major along lanes):
        out_group[s] = sum_p X_group[s-p] @ M_p
    """
    k = _cdiv(filtlen, N)
    GN = G * N
    wpad = np.zeros((N, k * N), dtype=np.float32)
    wpad[:, :filtlen] = w2
    M = np.zeros((P, GN, GN), dtype=np.float32)
    for g in range(G):            # output frame within group
        for j in range(k):        # filter tap block (hop offset)
            d = g - j             # input frame within group (may be negative)
            if d >= 0:
                p, m = 0, d
            else:
                p = (j - g + G - 1) // G
                m = d + p * G
            M[p, m * N:(m + 1) * N, g * N:(g + 1) * N] += wpad[:, j * N:(j + 1) * N]
    return M


def _make_kernel(P, S_tile, bw_tile, GN):
    def kernel(x_ref, m_ref, o_ref, carry_ref):
        # x_ref / o_ref: (S_tile, bw_tile, GN)   m_ref: (P, GN, GN)
        # carry_ref: (max(P-1,1), bw_tile, GN) = last P-1 input groups of the previous
        # frame-group tile (zeroed at the start of every bw tile's frame sweep).
        if P > 1:
            @pl.when(pl.program_id(1) == 0)
            def _init():
                carry_ref[...] = jnp.zeros(carry_ref.shape, carry_ref.dtype)

            xx = jnp.concatenate([carry_ref[...], x_ref[...]], axis=0)
        else:
            xx = x_ref[...]

        acc = None
        for p in range(P):
            lhs = xx[P - 1 - p: P - 1 - p + S_tile]             # (S_tile, bw_tile, GN)
            lhs = lhs.reshape(S_tile * bw_tile, GN)             # lane-dim preserved -> free
            u = jnp.dot(lhs, m_ref[p], preferred_element_type=jnp.float32)
            acc = u if acc is None else acc + u

        o_ref[...] = acc.reshape(S_tile, bw_tile, GN).astype(o_ref.dtype)

        if P > 1:
            carry_ref[...] = x_ref[S_tile - (P - 1):, :, :]
    return kernel


def mdct_synthesis(x, weight, *, vmem_block_bytes=2 * 1024 * 1024):
    """x: (B, N, T, W) f32, weight: (N, 1, filtlen, 1) f32 (PyTorch layout).

    Returns (B, 1, (T-1)*N + filtlen, W) f32, identical to ConvTranspose2d forward.
    """
    B, N, T, W = x.shape
    filtlen = weight.shape[2]
    L_out = (T - 1) * N + filtlen

    k = _cdiv(filtlen, N)                       # taps per hop
    G = 128 // math.gcd(N, 128)                 # frames per lane-dense group
    GN = G * N                                  # group width (multiple of 128)
    P = 1 + (k - 1 + G - 1) // G                # input groups feeding one output group
    S_in = _cdiv(T, G)                          # real input groups
    S_out = S_in + P - 1                        # output groups needed

    # --- tiling ------------------------------------------------------------------
    BW = B * W
    n_bw = _cdiv(BW, 64)
    bw_tile = _round_up(_cdiv(BW, n_bw), 8)     # sublane-aligned rows per block
    BW_pad = _round_up(BW, bw_tile)
    n_bw = BW_pad // bw_tile

    per_group_bytes = bw_tile * GN * 4
    S_tile_max = max(1, vmem_block_bytes // per_group_bytes)
    n_s = _cdiv(S_out, S_tile_max)
    S_tile = max(_cdiv(S_out, n_s), P - 1, 1)
    n_s = _cdiv(S_out, S_tile)
    S_pad = n_s * S_tile

    # --- tiny host-precomputed folded weights --------------------------------------
    w2 = np.asarray(weight)[:, 0, :, 0]                       # (N, filtlen)
    m_stack = jnp.asarray(_build_group_matrices(w2, N, filtlen, G, P))

    # --- (B, N, T, W) -> (S_pad, BW_pad, GN): one fused pad/transpose/reshape pass --
    xin = jnp.pad(x, ((0, 0), (0, 0), (0, S_pad * G - T), (0, 0)))
    xin = xin.reshape(B, N, S_pad, G, W)
    xin = jnp.transpose(xin, (2, 0, 4, 3, 1))                 # (S, B, W, G, N)
    xin = xin.reshape(S_pad, BW, GN)
    if BW_pad != BW:
        xin = jnp.pad(xin, ((0, 0), (0, BW_pad - BW), (0, 0)))

    out = pl.pallas_call(
        _make_kernel(P, S_tile, bw_tile, GN),
        out_shape=jax.ShapeDtypeStruct((S_pad, BW_pad, GN), jnp.float32),
        grid=(n_bw, n_s),
        in_specs=[
            pl.BlockSpec((S_tile, bw_tile, GN), lambda i, j: (j, i, 0)),
            pl.BlockSpec((P, GN, GN), lambda i, j: (0, 0, 0)),   # constant: DMA'd once
        ],
        out_specs=pl.BlockSpec((S_tile, bw_tile, GN), lambda i, j: (j, i, 0)),
        scratch_shapes=[pltpu.VMEM((max(P - 1, 1), bw_tile, GN), jnp.float32)],
        compiler_params=pltpu.CompilerParams(
            dimension_semantics=("parallel", "arbitrary")),
    )(xin, m_stack)

    # --- (S_pad, BW_pad, GN) -> (B, 1, L_out, W): one fused slice/transpose pass ----
    out = out[:, :BW, :].reshape(S_pad, B, W, GN)
    out = jnp.transpose(out, (1, 0, 3, 2))                    # (B, S_pad, GN, W)
    out = out.reshape(B, S_pad * GN, W)[:, :L_out, :]
    return out[:, None, :, :]                                 # (B, 1, L_out, W)


def reference_numpy(x, weight):
    """Direct ConvTranspose2d semantics in numpy (for verification)."""
    B, N, T, W = x.shape
    filtlen = weight.shape[2]
    L_out = (T - 1) * N + filtlen
    out = np.zeros((B, 1, L_out, W), dtype=np.float32)
    for b in range(B):
        for t in range(T):
            for c in range(N):
                out[b, 0, t * N: t * N + filtlen, :] += (
                    weight[c, 0, :, 0][:, None] * x[b, c, t, :][None, :]
                )
    return out


if __name__ == "__main__":
    # Small MDCT-like configuration: N subbands, filtlen = 2*N.
    N, filtlen = 8, 16
    B, T, W = 2, 16, 3

    key = jax.random.PRNGKey(0)
    x = jax.random.normal(key, (B, N, T, W), dtype=jnp.float32)
    weight = jnp.asarray(mdct_syn_init(filtlen, N))

    # weight is a closed-over constant, so the numpy-side matrix build happens at trace time.
    syn = jax.jit(lambda inp: mdct_synthesis(inp, weight))
    out = jax.block_until_ready(syn(x))

    assert out.shape == (B, 1, (T - 1) * N + filtlen, W), out.shape
    ref = reference_numpy(np.asarray(x), np.asarray(weight))
    np.testing.assert_allclose(np.asarray(out), ref, rtol=1e-4, atol=1e-4)

    print("KERNEL_OK")
</pallas_src>

<mosaic_0001>
module attributes {stable_mosaic.version = 11 : i64} {
  func.func @kernel(%arg0: i32, %arg1: i32, %arg2: memref<2x8x128xf32, #tpu.memory_space<vmem>>, %arg3: memref<2x128x128xf32, #tpu.memory_space<vmem>>, %arg4: memref<2x8x128xf32, #tpu.memory_space<vmem>>, %arg5: memref<1x8x128xf32, #tpu.memory_space<vmem>>) attributes {dimension_semantics = [#tpu.dimension_semantics<parallel>, #tpu.dimension_semantics<arbitrary>], iteration_bounds = array<i64: 1, 1>, scalar_prefetch = 0 : i64, scratch_operands = 1 : i64, tpu.core_type = #tpu.core_type<tc>, window_params = [{transform_indices = @transform_0, window_bounds = array<i64: 2, 8, 128>}, {pipeline_mode = #tpu.pipeline_mode<synchronous>, transform_indices = @transform_1, window_bounds = array<i64: 2, 128, 128>}, {transform_indices = @transform_2, window_bounds = array<i64: 2, 8, 128>}]} {
    %c0_i32 = arith.constant 0 : i32
    %0 = arith.cmpi eq, %arg1, %c0_i32 : i32
    %1 = arith.extui %0 : i1 to i32
    %c0_i32_0 = arith.constant 0 : i32
    %2 = arith.cmpi ne, %1, %c0_i32_0 : i32
    scf.if %2 {
      %cst_21 = arith.constant 0.000000e+00 : f32
      %21 = vector.broadcast %cst_21 : f32 to vector<1x8x128xf32>
      %c0_22 = arith.constant 0 : index
      %c0_23 = arith.constant 0 : index
      %c0_24 = arith.constant 0 : index
      %22 = vector.load %arg5[%c0_22, %c0_23, %c0_24] : memref<1x8x128xf32, #tpu.memory_space<vmem>>, vector<1x8x128xf32>
      tpu.vector_store %arg5[%c0_22, %c0_23, %c0_24], %21 {strides = array<i32>} : memref<1x8x128xf32, #tpu.memory_space<vmem>>, vector<1x8x128xf32>,
    } else {
    }
    %c0 = arith.constant 0 : index
    %c0_1 = arith.constant 0 : index
    %c0_2 = arith.constant 0 : index
    %3 = vector.load %arg5[%c0, %c0_1, %c0_2] : memref<1x8x128xf32, #tpu.memory_space<vmem>>, vector<1x8x128xf32>
    %c0_3 = arith.constant 0 : index
    %c0_4 = arith.constant 0 : index
    %c0_5 = arith.constant 0 : index
    %4 = vector.load %arg2[%c0_3, %c0_4, %c0_5] : memref<2x8x128xf32, #tpu.memory_space<vmem>>, vector<2x8x128xf32>
    %5 = tpu.concatenate %3, %4 in 0 : vector<1x8x128xf32>, vector<2x8x128xf32> -> vector<3x8x128xf32>
    %6 = vector.extract_strided_slice %5 {offsets = [1, 0, 0], sizes = [2, 8, 128], strides = [1, 1, 1]} : vector<3x8x128xf32> to vector<2x8x128xf32>
    %7 = vector.shape_cast %6 : vector<2x8x128xf32> to vector<16x128xf32>
    %c0_6 = arith.constant 0 : index
    %c0_7 = arith.constant 0 : index
    %c0_8 = arith.constant 0 : index
    %8 = vector.load %arg3[%c0_6, %c0_7, %c0_8] : memref<2x128x128xf32, #tpu.memory_space<vmem>>, vector<1x128x128xf32>
    %9 = vector.shape_cast %8 : vector<1x128x128xf32> to vector<128x128xf32>
    %cst = arith.constant dense<0.000000e+00> : vector<16x128xf32>
    %10 = tpu.matmul %7, %9, %cst {dimension_numbers = #tpu.dot_dimension_numbers<[1], [0], [0], [1], [0, 0, 1, 1], [], []>} : vector<16x128xf32>, vector<128x128xf32>, vector<16x128xf32> -> vector<16x128xf32>
    %11 = vector.extract_strided_slice %5 {offsets = [0, 0, 0], sizes = [2, 8, 128], strides = [1, 1, 1]} : vector<3x8x128xf32> to vector<2x8x128xf32>
    %12 = vector.shape_cast %11 : vector<2x8x128xf32> to vector<16x128xf32>
    %c1 = arith.constant 1 : index
    %c0_9 = arith.constant 0 : index
    %c0_10 = arith.constant 0 : index
    %13 = vector.load %arg3[%c1, %c0_9, %c0_10] : memref<2x128x128xf32, #tpu.memory_space<vmem>>, vector<1x128x128xf32>
    %14 = vector.shape_cast %13 : vector<1x128x128xf32> to vector<128x128xf32>
    %cst_11 = arith.constant dense<0.000000e+00> : vector<16x128xf32>
    %15 = tpu.matmul %12, %14, %cst_11 {dimension_numbers = #tpu.dot_dimension_numbers<[1], [0], [0], [1], [0, 0, 1, 1], [], []>} : vector<16x128xf32>, vector<128x128xf32>, vector<16x128xf32> -> vector<16x128xf32>
    %16 = arith.addf %10, %15 : vector<16x128xf32>
    %17 = vector.shape_cast %16 : vector<16x128xf32> to vector<2x8x128xf32>
    %c0_12 = arith.constant 0 : index
    %c0_13 = arith.constant 0 : index
    %c0_14 = arith.constant 0 : index
    %18 = vector.load %arg4[%c0_12, %c0_13, %c0_14] : memref<2x8x128xf32, #tpu.memory_space<vmem>>, vector<2x8x128xf32>
    tpu.vector_store %arg4[%c0_12, %c0_13, %c0_14], %17 {strides = array<i32>} : memref<2x8x128xf32, #tpu.memory_space<vmem>>, vector<2x8x128xf32>,
    %c1_15 = arith.constant 1 : index
    %c0_16 = arith.constant 0 : index
    %c0_17 = arith.constant 0 : index
    %19 = vector.load %arg2[%c1_15, %c0_16, %c0_17] : memref<2x8x128xf32, #tpu.memory_space<vmem>>, vector<1x8x128xf32>
    %c0_18 = arith.constant 0 : index
    %c0_19 = arith.constant 0 : index
    %c0_20 = arith.constant 0 : index
    %20 = vector.load %arg5[%c0_18, %c0_19, %c0_20] : memref<1x8x128xf32, #tpu.memory_space<vmem>>, vector<1x8x128xf32>
    tpu.vector_store %arg5[%c0_18, %c0_19, %c0_20], %19 {strides = array<i32>} : memref<1x8x128xf32, #tpu.memory_space<vmem>>, vector<1x8x128xf32>,
    return
  }
  func.func @transform_0(%arg0: i32, %arg1: i32) -> (i32, i32, i32) {
    %c0_i32 = arith.constant 0 : i32
    %c0_i32_0 = arith.constant 0 : i32
    return %arg1, %arg0, %c0_i32 : i32, i32, i32
  }
  func.func @transform_1(%arg0: i32, %arg1: i32) -> (i32, i32, i32) {
    %c0_i32 = arith.constant 0 : i32
    %c0_i32_0 = arith.constant 0 : i32
    %c0_i32_1 = arith.constant 0 : i32
    %c0_i32_2 = arith.constant 0 : i32
    return %c0_i32, %c0_i32_0, %c0_i32_1 : i32, i32, i32
  }
  func.func @transform_2(%arg0: i32, %arg1: i32) -> (i32, i32, i32) {
    %c0_i32 = arith.constant 0 : i32
    %c0_i32_0 = arith.constant 0 : i32
    return %arg1, %arg0, %c0_i32 : i32, i32, i32
  }
}

</mosaic_0001>

<bundles_post_ra>
// kernel: _lambda_.1
= control target key start
LH: loop header
LB: loop body
LE: loop exit
PB: predicated region body
PF: predicated region fallthrough
CT: control target
= control target key end

     0   :  { %v401_v3 = vmov 0.0   ;;  %s525_s1 = inlined_call_operand.vmem [shape: f32[2,128,128], index: 1, kind: input, shape index: {}]   ;;  %s526_s0 = inlined_call_operand.vmem [shape: f32[2,8,128], index: 0, kind: input, shape index: {}]   ;;  %s527_s2 = inlined_call_operand.vmem [shape: f32[2,8,128], index: 2, kind: output, shape index: {}]  }
   0x1   :  { %v211_v0 = vld [vmem:[%s525_s1 + $0x80] sm:$0xff]  ;;  %v212_v1 = vld [vmem:[%s525_s1 + $0x88] sm:$0xff]  ;;  %296 = vmatprep.mubr.f32.mxu1 %v401_v3  ;;  %v213_v6 = vld [vmem:[%s525_s1 + $0x90] sm:$0xff] }
   0x2   :  { %v19_v2 = vld [vmem:[%s525_s1] sm:$0xff]  ;;  %v334_v4 = vpack.c.bf16 %v212_v1, %v211_v0  ;;  %v20_v5 = vld [vmem:[%s525_s1 + $0x8] sm:$0xff]  ;;  %v214_v7 = vld [vmem:[%s525_s1 + $0x98] sm:$0xff] }
   0x3   :  { %v366_v8 = vpack.c.bf16 %v20_v5, %v19_v2  ;;  %v338_v9 = vpack.c.bf16 %v214_v7, %v213_v6  ;;  %v21_v10 = vld [vmem:[%s525_s1 + $0x10] sm:$0xff]  ;;  %v22_v11 = vld [vmem:[%s525_s1 + $0x18] sm:$0xff]  ;;  %v215_v12 = vld [vmem:[%s525_s1 + $0xa0] sm:$0xff] }
   0x4   :  { %335 = vmatprep.subr.bf16.mxu1 %v334_v4  ;;  %v370_v13 = vpack.c.bf16 %v22_v11, %v21_v10  ;;  %v216_v14 = vld [vmem:[%s525_s1 + $0xa8] sm:$0xff]  ;;  %v23_v15 = vld [vmem:[%s525_s1 + $0x20] sm:$0xff]  ;;  %v217_v19 = vld [vmem:[%s525_s1 + $0xb0] sm:$0xff] }
   0x5   :  { %v24_v16 = vld [vmem:[%s525_s1 + $0x28] sm:$0xff]  ;;  %367 = vmatprep.subr.bf16.mxu0 %v366_v8  ;;  %337 = vmatpush3.bf16.msra.mxu1 %v334_v4  ;;  %v342_v17 = vpack.c.bf16 %v216_v14, %v215_v12  ;;  %v218_v20 = vld [vmem:[%s525_s1 + $0xb8] sm:$0xff]  ;;  %v25_v21 = vld [vmem:[%s525_s1 + $0x30] sm:$0xff] }
   0x6   :  { %369 = vmatpush3.bf16.msra.mxu0 %v366_v8  ;;  %339 = vmatprep.subr.bf16.mxu1 %v338_v9  ;;  %v374_v18 = vpack.c.bf16 %v24_v16, %v23_v15  ;;  %v26_v22 = vld [vmem:[%s525_s1 + $0x38] sm:$0xff]  ;;  %v346_v23 = vpack.c.bf16 %v218_v20, %v217_v19  ;;  %v219_v25 = vld [vmem:[%s525_s1 + $0xc0] sm:$0xff]  ;;  %v220_v26 = vld [vmem:[%s525_s1 + $0xc8] sm:$0xff] }
   0x7   :  { %371 = vmatprep.subr.bf16.mxu0 %v370_v13  ;;  %v378_v24 = vpack.c.bf16 %v26_v22, %v25_v21  ;;  %v17_v27 = vld [vmem:[%s526_s0] sm:$0xff]  ;;  %v28_v29 = vld [vmem:[%s525_s1 + $0x48] sm:$0xff]  ;;  %v350_v30 = vpack.c.bf16 %v220_v26, %v219_v25  ;;  %v221_v32 = vld [vmem:[%s525_s1 + $0xd0] sm:$0xff] }
   0x8   :  { %v27_v28 = vld [vmem:[%s525_s1 + $0x40] sm:$0xff]  ;;  %331 = vmatprep.mubr.f32.mxu0 %v17_v27  ;;  %v222_v33 = vld [vmem:[%s525_s1 + $0xd8] sm:$0xff]  ;;  %v29_v34 = vld [vmem:[%s525_s1 + $0x50] sm:$0xff] }
   0x9   :  { %341 = vmatpush3.bf16.msra.mxu1 %v338_v9  ;;  %v382_v31 = vpack.c.bf16 %v28_v29, %v27_v28  ;;  %v30_v35 = vld [vmem:[%s525_s1 + $0x58] sm:$0xff]  ;;  %v354_v36 = vpack.c.bf16 %v222_v33, %v221_v32  ;;  %v223_v38 = vld [vmem:[%s525_s1 + $0xe0] sm:$0xff]  ;;  %v224_v39 = vld [vmem:[%s525_s1 + $0xe8] sm:$0xff] }
   0xa   :  { %373 = vmatpush3.bf16.msra.mxu0 %v370_v13  ;;  %343 = vmatprep.subr.bf16.mxu1 %v342_v17  ;;  %v386_v37 = vpack.c.bf16 %v30_v35, %v29_v34  ;;  %v31_v40 = vld [vmem:[%s525_s1 + $0x60] sm:$0xff]  ;;  %v32_v41 = vld [vmem:[%s525_s1 + $0x68] sm:$0xff]  ;;  %v358_v42 = vpack.c.bf16 %v224_v39, %v223_v38  ;;  %v225_v44 = vld [vmem:[%s525_s1 + $0xf0] sm:$0xff] }
   0xb   :  { %375 = vmatprep.subr.bf16.mxu0 %v374_v18  ;;  %v390_v43 = vpack.c.bf16 %v32_v41, %v31_v40  ;;  %v226_v45 = vld [vmem:[%s525_s1 + $0xf8] sm:$0xff]  ;;  %v33_v46 = vld [vmem:[%s525_s1 + $0x70] sm:$0xff]  ;;  %v18_v50 = vld [vmem:[%s526_s0 + $0x8] sm:$0xff] }
   0xc   :  { %v34_v47 = vld [vmem:[%s525_s1 + $0x78] sm:$0xff]  ;;  %v362_v48 = vpack.c.bf16 %v226_v45, %v225_v44 }
   0xd   :  { %345 = vmatpush3.bf16.msra.mxu1 %v342_v17  ;;  %v394_v49 = vpack.c.bf16 %v34_v47, %v33_v46 }
   0xe   :  { %377 = vmatpush3.bf16.msra.mxu0 %v374_v18  ;;  %347 = vmatprep.subr.bf16.mxu1 %v346_v23 }
   0xf   :  { %379 = vmatprep.subr.bf16.mxu0 %v378_v24 }
  0x11   :  { %349 = vmatpush3.bf16.msra.mxu1 %v346_v23 }
  0x12   :  { %381 = vmatpush3.bf16.msra.mxu0 %v378_v24  ;;  %351 = vmatprep.subr.bf16.mxu1 %v350_v30 }
  0x13   :  { %383 = vmatprep.subr.bf16.mxu0 %v382_v31 }
  0x15   :  { %353 = vmatpush3.bf16.msra.mxu1 %v350_v30 }
  0x16   :  { %385 = vmatpush3.bf16.msra.mxu0 %v382_v31  ;;  %355 = vmatprep.subr.bf16.mxu1 %v354_v36 }
  0x17   :  { %387 = vmatprep.subr.bf16.mxu0 %v386_v37 }
  0x19   :  { %357 = vmatpush3.bf16.msra.mxu1 %v354_v36 }
  0x1a   :  { %389 = vmatpush3.bf16.msra.mxu0 %v386_v37  ;;  %359 = vmatprep.subr.bf16.mxu1 %v358_v42 }
  0x1b   :  { %391 = vmatprep.subr.bf16.mxu0 %v390_v43 }
  0x1d   :  { %361 = vmatpush3.bf16.msra.mxu1 %v358_v42 }
  0x1e   :  { %393 = vmatpush3.bf16.msra.mxu0 %v390_v43  ;;  %363 = vmatprep.subr.bf16.mxu1 %v362_v48 }
  0x1f   :  { %395 = vmatprep.subr.bf16.mxu0 %v394_v49 }
  0x21   :  { %365 = vmatpush3.bf16.msra.mxu1 %v362_v48 }
  0x22   :  { %397 = vmatpush3.bf16.msra.mxu0 %v394_v49 }
  0x24   :  { %297 = vmatmul.mubr.f32.vlgmr.msra.gmra.mrb[0].mxu1 %v17_v27 }
  0x25   :  { %332 = vmatmul.mubr.f32.vlgmr.msra.gmra.mrb[0].mxu0 %v18_v50 }
  0xf7   :  { %v298_v51 = vpop.f32.mrb[0].mxu1 }
  0xf8   :  { %v333_v52 = vpop.f32.mrb[0].mxu0  ;;  %v118_v53 = vpop.f32.mrb[1].mxu1 }
  0xf9   :  { %v199_v54 = vadd.f32 %v333_v52, %v298_v51  ;;  %v193_v55 = vpop.f32.mrb[1].mxu0 }
  0xfa   :  { %v194_v56 = vadd.f32 %v193_v55, %v118_v53 }
  0xfb   :  { %203 = vst [vmem:[%s527_s2 + $0x8] sm:$0xff] %v199_v54 }
  0xfc   :  { %202 = vst [vmem:[%s527_s2] sm:$0xff] %v194_v56 }

</bundles_post_ra>
